<compile_context>
chip_gen: v7x
topology: tpu7x:2x2x1
jax: 0.10.0
libtpu: 0.0.40
codegen_flags: <defaults>
</compile_context>

<pallas_src>
import jax
import jax.numpy as jnp
from jax.experimental import pallas as pl
from jax.experimental.pallas import tpu as pltpu

_LANE = 128

# Direct HBM->HBM DMA path.
_TARGET_DMA_BYTES = 8 << 20      # aim for ~8 MiB per DMA chunk
_MAX_DMA_CHUNKS = 8              # a few concurrent DMAs; start all, then wait

# BlockSpec (VMEM-staged) fallback path.
_MAX_LANE_TILE = 4096            # lane tile can now equal the widest C chosen
_TARGET_TILE_BYTES = 4 << 20     # ~4 MiB tiles -> ~16 MiB double-buffered in+out
_VMEM_LIMIT_BYTES = 40 << 20     # fits v7x's 64 MiB physical; lifts v5e's 16 MiB default


# ---------------------------------------------------------------------------
# Primary forced-copy path: chunked HBM->HBM DMA (no VMEM staging at all).
# ---------------------------------------------------------------------------

def _lane_dense_2d(total: int):
    """Pick (rows, cols) with cols a large multiple of 128 when possible."""
    for lane in (4096, 2048, 1024, 512, 256, 128):
        if total % lane == 0:
            return total // lane, lane
    # Ragged element count: a single contiguous row is fine for an HBM->HBM DMA
    # (no vreg stores involved, so lane width does not matter here).
    return 1, total


def _identity_dma_copy(x: jax.Array) -> jax.Array:
    orig_shape = x.shape
    dtype = x.dtype
    total = x.size

    R, C = _lane_dense_2d(total)
    x2 = x.reshape(R, C)

    itemsize = jnp.dtype(dtype).itemsize
    row_bytes = max(C * itemsize, 1)
    rows_per_chunk = max(1, _TARGET_DMA_BYTES // row_bytes)
    n_chunks = max(1, min(_MAX_DMA_CHUNKS, pl.cdiv(R, rows_per_chunk)))
    rows_per_chunk = pl.cdiv(R, n_chunks)

    # Static (row_start, n_rows) chunk list; last chunk takes the remainder.
    chunks = []
    r = 0
    while r < R:
        nr = min(rows_per_chunk, R - r)
        chunks.append((r, nr))
        r += nr
    n_chunks = len(chunks)

    def kernel(x_hbm, o_hbm, sems):
        copies = []
        for idx, (r0, nr) in enumerate(chunks):
            if n_chunks == 1:
                src, dst = x_hbm, o_hbm
            else:
                src = x_hbm.at[pl.ds(r0, nr), :]
                dst = o_hbm.at[pl.ds(r0, nr), :]
            cp = pltpu.make_async_copy(src, dst, sems.at[idx])
            cp.start()
            copies.append(cp)
        for cp in copies:
            cp.wait()

    out2 = pl.pallas_call(
        kernel,
        out_shape=jax.ShapeDtypeStruct((R, C), dtype),
        in_specs=[pl.BlockSpec(memory_space=pl.ANY)],
        out_specs=pl.BlockSpec(memory_space=pl.ANY),
        scratch_shapes=[pltpu.SemaphoreType.DMA((n_chunks,))],
    )(x2)

    return out2.reshape(orig_shape)


# ---------------------------------------------------------------------------
# Fallback forced-copy path: lane-dense, padded, VMEM-staged BlockSpec copy.
# ---------------------------------------------------------------------------

def _identity_kernel(x_ref, o_ref):
    o_ref[...] = x_ref[...]


def _sublane_multiple(dtype) -> int:
    # f32 -> 8, bf16 -> 16, int8/fp8 -> 32 (avoids packed-layout relayouts).
    itemsize = jnp.dtype(dtype).itemsize
    return max(8, 32 // max(itemsize, 1))


def _identity_blockspec_copy(x: jax.Array) -> jax.Array:
    orig_shape = x.shape
    dtype = x.dtype
    total = x.size
    if total == 0:
        return x

    itemsize = jnp.dtype(dtype).itemsize
    sub = _sublane_multiple(dtype)

    # Lane width: as wide as possible (up to _MAX_LANE_TILE) while keeping the
    # pad-to-(sub*C) overhead negligible for larger tensors.
    C = _LANE
    for cand in (4096, 2048, 1024, 512, 256, 128):
        if cand <= _MAX_LANE_TILE and total >= cand * sub:
            C = cand
            break

    padded = pl.cdiv(total, C * sub) * (C * sub)
    flat = x.reshape(total)
    if padded != total:
        # Padding keeps the output 128-lane dense (unmasked vst) even for ragged
        # element counts; the extra DMA bytes are tiny.
        flat = jnp.pad(flat, (0, padded - total))
    R = padded // C

    # Sublane tile sized so one tile is ~_TARGET_TILE_BYTES.
    rows_budget = max(sub, (_TARGET_TILE_BYTES // (C * itemsize) // sub) * sub)
    tr = min(R, rows_budget)
    # v7x megacore: keep >=2 "parallel" grid steps when the array spans more
    # than one sublane group so both TensorCores can drive DMA traffic.
    if R > sub and tr >= R:
        tr = max(sub, (((R + 1) // 2) // sub) * sub)

    grid = (pl.cdiv(R, tr),)

    out2 = pl.pallas_call(
        _identity_kernel,
        out_shape=jax.ShapeDtypeStruct((R, C), dtype),
        grid=grid,
        in_specs=[pl.BlockSpec((tr, C), lambda i: (i, 0))],
        out_specs=pl.BlockSpec((tr, C), lambda i: (i, 0)),
        compiler_params=pltpu.CompilerParams(
            dimension_semantics=("parallel",),
            vmem_limit_bytes=_VMEM_LIMIT_BYTES,
        ),
    )(flat.reshape(R, C))

    out_flat = out2.reshape(padded)
    if padded != total:
        out_flat = out_flat[:total]
    return out_flat.reshape(orig_shape)


# ---------------------------------------------------------------------------
# Dispatch + public API.
# ---------------------------------------------------------------------------

_DMA_PATH_OK = None  # None = not probed yet; True/False after first forced copy.


def _identity_pallas_copy(x: jax.Array) -> jax.Array:
    global _DMA_PATH_OK
    if x.size == 0:
        return x
    if _DMA_PATH_OK is None:
        # Probe once: direct HBM->HBM DMA is the fastest identity copy; fall
        # back to the lane-dense BlockSpec copy if this jax/libtpu combination
        # rejects ANY->ANY DMAs.
        try:
            y = jax.block_until_ready(_identity_dma_copy(x))
            _DMA_PATH_OK = True
            return y
        except Exception:
            _DMA_PATH_OK = False
    if _DMA_PATH_OK:
        return _identity_dma_copy(x)
    return _identity_blockspec_copy(x)


def identity(x: jax.Array, *, force_pallas_copy: bool = False) -> jax.Array:
    """Identity forward pass (matches torch nn.Identity).

    Default path returns `x` untouched -- zero HBM traffic, the correct
    implementation of an identity.  `force_pallas_copy=True` routes through the
    Pallas kernel (chunked HBM->HBM DMA) for demonstration/benchmarking.
    """
    if not force_pallas_copy:
        return x
    return _identity_pallas_copy(x)


if __name__ == "__main__":
    key = jax.random.PRNGKey(0)

    # NCHW input, consistent with PyTorch conv-style encoder inputs.
    x = jax.random.normal(key, (2, 4, 16, 16), dtype=jnp.float32)

    # Fast path: true identity, no data movement.
    y_fast = identity(x)
    assert y_fast.shape == x.shape and y_fast.dtype == x.dtype
    assert bool(jnp.array_equal(y_fast, x))

    # Forced Pallas path: chunked HBM->HBM DMA copy.
    y = jax.block_until_ready(identity(x, force_pallas_copy=True))
    assert y.shape == x.shape, (y.shape, x.shape)
    assert y.dtype == x.dtype, (y.dtype, x.dtype)
    assert bool(jnp.array_equal(y, x)), "Identity DMA-copy output != input"

    # Ragged, non-128-multiple element count in bf16.
    x2 = jax.random.normal(jax.random.PRNGKey(1), (3, 5, 7), dtype=jnp.bfloat16)
    y2 = jax.block_until_ready(identity(x2, force_pallas_copy=True))
    assert y2.shape == x2.shape and y2.dtype == x2.dtype
    assert bool(jnp.array_equal(y2, x2)), "Identity (ragged) output != input"

    # Explicitly exercise the padded lane-dense BlockSpec variant too.
    y3 = jax.block_until_ready(_identity_blockspec_copy(x2))
    assert bool(jnp.array_equal(y3, x2)), "BlockSpec fallback (ragged) mismatch"
    y4 = jax.block_until_ready(_identity_blockspec_copy(x))
    assert bool(jnp.array_equal(y4, x)), "BlockSpec fallback mismatch"

    print("KERNEL_OK")
</pallas_src>

<mosaic_0001>
module attributes {stable_mosaic.version = 11 : i64} {
  func.func @kernel(%arg0: memref<1x2048xf32, #tpu.memory_space<any>>, %arg1: memref<1x2048xf32, #tpu.memory_space<any>>, %arg2: memref<1x!tpu.dma_semaphore, #tpu.memory_space<semaphore_mem>>) attributes {dimension_semantics = [], scalar_prefetch = 0 : i64, scratch_operands = 1 : i64, tpu.core_type = #tpu.core_type<tc>} {
    %c0_i32 = arith.constant 0 : i32
    %0 = tpu.memref_slice %arg2[%c0_i32] : memref<1x!tpu.dma_semaphore, #tpu.memory_space<semaphore_mem>> -> memref<1x!tpu.dma_semaphore, #tpu.memory_space<semaphore_mem>>
    %1 = tpu.memref_squeeze %0 : memref<1x!tpu.dma_semaphore, #tpu.memory_space<semaphore_mem>> -> memref<!tpu.dma_semaphore, #tpu.memory_space<semaphore_mem>>
    tpu.enqueue_dma source(%arg0 : memref<1x2048xf32, #tpu.memory_space<any>>) target(%arg1 : memref<1x2048xf32, #tpu.memory_space<any>>) target_semaphore(%1 : memref<!tpu.dma_semaphore, #tpu.memory_space<semaphore_mem>>)
    %c0_i32_0 = arith.constant 0 : i32
    %2 = tpu.memref_slice %arg2[%c0_i32_0] : memref<1x!tpu.dma_semaphore, #tpu.memory_space<semaphore_mem>> -> memref<1x!tpu.dma_semaphore, #tpu.memory_space<semaphore_mem>>
    %3 = tpu.memref_squeeze %2 : memref<1x!tpu.dma_semaphore, #tpu.memory_space<semaphore_mem>> -> memref<!tpu.dma_semaphore, #tpu.memory_space<semaphore_mem>>
    tpu.wait_dma2 semaphore(%3 : memref<!tpu.dma_semaphore, #tpu.memory_space<semaphore_mem>>) src(%arg0 : memref<1x2048xf32, #tpu.memory_space<any>>) dst(%arg1 : memref<1x2048xf32, #tpu.memory_space<any>>)
    return
  }
}

module attributes {stable_mosaic.version = 11 : i64} {
  func.func @_identity_kernel(%arg0: i32, %arg1: memref<8x256xf32, #tpu.memory_space<vmem>>, %arg2: memref<8x256xf32, #tpu.memory_space<vmem>>) attributes {dimension_semantics = [#tpu.dimension_semantics<parallel>], iteration_bounds = array<i64: 1>, scalar_prefetch = 0 : i64, scratch_operands = 0 : i64, tpu.core_type = #tpu.core_type<tc>, window_params = [{transform_indices = @transform_0, window_bounds = array<i64: 8, 256>}, {transform_indices = @transform_1, window_bounds = array<i64: 8, 256>}]} {
    %c0 = arith.constant 0 : index
    %c0_0 = arith.constant 0 : index
    %0 = vector.load %arg1[%c0, %c0_0] : memref<8x256xf32, #tpu.memory_space<vmem>>, vector<8x256xf32>
    %c0_1 = arith.constant 0 : index
    %c0_2 = arith.constant 0 : index
    %1 = vector.load %arg2[%c0_1, %c0_2] : memref<8x256xf32, #tpu.memory_space<vmem>>, vector<8x256xf32>
    tpu.vector_store %arg2[%c0_1, %c0_2], %0 {strides = array<i32>} : memref<8x256xf32, #tpu.memory_space<vmem>>, vector<8x256xf32>,
    return
  }
  func.func @transform_0(%arg0: i32) -> (i32, i32) {
    %c0_i32 = arith.constant 0 : i32
    %c0_i32_0 = arith.constant 0 : i32
    return %arg0, %c0_i32 : i32, i32
  }
  func.func @transform_1(%arg0: i32) -> (i32, i32) {
    %c0_i32 = arith.constant 0 : i32
    %c0_i32_0 = arith.constant 0 : i32
    return %arg0, %c0_i32 : i32, i32
  }
}

</mosaic_0001>

<bundles_post_ra>
// kernel: tpu_custom_call.1
= control target key start
LH: loop header
LB: loop body
LE: loop exit
PB: predicated region body
PF: predicated region fallthrough
CT: control target
= control target key end

     0   :  { %s34_s6 = smov [#allocation2]   ;;  %s35_s7 = smov [#allocation3]   ;;  %s53_s0 = inlined_call_operand.hbm [shape: f32[1,2048], index: 0, kind: input, shape index: {}]   ;;  %s54_s1 = inlined_call_operand.hbm [shape: f32[1,2048], index: 1, kind: output, shape index: {}]  }
   0x1   :  { %s36_s8 = smov 0  }
   0x2   :  { %18 = dma.general %s53_s0, 256, %s54_s1, %s34_s6, %s35_s7, [#allocation4], %s36_s8, 0  }
   0x3   :  { %32 = dma.done.wait [#allocation2], 256 }
   0x4   :  { %33 = vsyncadd [#allocation2], 4294967040 }
   0x5   :  { %22 = vsyncmov [#allocation2] }
   0x8   :  { %s23_s13 = vpop.sfrf %22 }
   0x9   :  { %p28_p0 = scmp.ne.s32.totalorder %s23_s13, 0 }
   0xb   :  { %27 = shalt.err (%p28_p0)  }

// kernel: tpu_custom_call.1
= control target key start
LH: loop header
LB: loop body
LE: loop exit
PB: predicated region body
PF: predicated region fallthrough
CT: control target
= control target key end

     0   :  { %6 = vsyncpa [#allocation3], 0  ;;  %s126_s0 = inlined_call_operand.hbm [shape: f32[8,256], index: 0, kind: input, shape index: {}]   ;;  %s127_s1 = inlined_call_operand.hbm [shape: f32[8,256], index: 1, kind: output, shape index: {}]  }
   0x1   :  { %7 = vsyncpa [#allocation4], 0  ;;  %s90_s6 = smov [#allocation2]   ;;  %s42_s10 = scalar_lea.hbm %s126_s0, 256 }
   0x2   :  { %s14_s7 = sshll.u32 %s90_s6, 4  ;;  %p43_p0 = scmp.ne.s32.totalorder %s126_s0, %s42_s10  ;;  %s15_s7 = int_to_ptr.vmem [resolvable:$true] %s14_s7 }
   0x3   :  { %p46_p1 = scmp.lt.u32.totalorder %s42_s10, %s126_s0 }
   0x5   :  { %p48_p2 = pnand %p46_p1, %p43_p0 }
   0x7   :  { %51 = shalt.err (!%p48_p2)
}
   0x8   :  { %s52_s15 = scalar_lea.vmem %s15_s7, 256  ;;  %p57_p4 = scmp.lt.s32.totalorder %s15_s7, %s15_s7 }
   0x9   :  { %p53_p3 = scmp.ne.s32.totalorder %s15_s7, %s52_s15  ;;  %p58_p5 = scmp.lt.s32.totalorder %s52_s15, %s52_s15 }
   0xb   :  { %p59_p6 = por %p58_p5, %p57_p4 }
   0xd   :  { %p60_p7 = pnand %p59_p6, %p53_p3 }
   0xf   :  { %63 = shalt.err (!%p60_p7)
}
  0x10   :  { %17 = dma.hbm_to_vmem [thread:$0]  %s126_s0, 256, %s15_s7, [#allocation3]  }
  0x11   :  { %86 = dma.done.wait [#allocation3], 256  }
  0x12   :  { %87 = vsyncadd [#allocation3], 4294967040  ;;  %s91_s18 = smov [#allocation5]   ;;  %v21_v0 = vld [vmem:[#allocation2] sm:$0xff]  ;;  %v22_v1 = vld [vmem:[#allocation2 + $0x8] sm:$0xff] }
  0x13   :  { %s31_s19 = sshll.u32 %s91_s18, 4  ;;  %23 = vst [vmem:[#allocation5] sm:$0xff] %v21_v0  ;;  %24 = vst [vmem:[#allocation5 + $0x8] sm:$0xff] %v22_v1  ;;  %s32_s19 = int_to_ptr.vmem [resolvable:$true] %s31_s19 }
  0x14   :  { %s64_s20 = scalar_lea.vmem %s32_s19, 256  ;;  %p69_p9 = scmp.lt.s32.totalorder %s32_s19, %s32_s19 }
  0x15   :  { %p65_p8 = scmp.ne.s32.totalorder %s32_s19, %s64_s20  ;;  %p70_p10 = scmp.lt.s32.totalorder %s64_s20, %s64_s20 }
  0x17   :  { %p71_p11 = por %p70_p10, %p69_p9 }
  0x19   :  { %p72_p12 = pnand %p71_p11, %p65_p8 }
  0x1b   :  { %75 = shalt.err (!%p72_p12)
}
  0x1c   :  { %s76_s0 = scalar_lea.hbm %s127_s1, 256 }
  0x1d   :  { %p77_p13 = scmp.ne.s32.totalorder %s127_s1, %s76_s0  ;;  %p80_p0 = scmp.lt.u32.totalorder %s76_s0, %s127_s1 }
  0x1f   :  { %p82_p1 = pnand %p80_p0, %p77_p13 }
  0x21   :  { %85 = shalt.err (!%p82_p1)
}
  0x22   :  { %34 = dma.vmem_to_hbm [thread:$0]  %s32_s19, 256, %s127_s1, [#allocation4]  }
  0x23   :  { %88 = dma.done.wait [#allocation4], 256  }
  0x24   :  { %89 = vsyncadd [#allocation4], 4294967040 }
  0x25   :  { %38 = vsyncpa [#allocation3], 1 }
  0x26   :  { %39 = vsyncpa [#allocation4], 1 }

</bundles_post_ra>
